<compile_context>
chip_gen: v7x
topology: tpu7x:2x2x1
jax: 0.10.0
libtpu: 0.0.40
codegen_flags: <defaults>
</compile_context>

<pallas_src>
import jax
import jax.numpy as jnp
from jax.experimental import pallas as pl
from jax.experimental.pallas import tpu as pltpu


# ---------------------------------------------------------------------------
# Kernel
# ---------------------------------------------------------------------------

def outconv_kernel(x_ref, w_ref, b_ref, o_ref):
    """Fused 1x1 conv (channel matmul) + bias.

    x_ref: (1, Cin, HW)   one batch element, channels-major, flattened spatial
    w_ref: (Cout, Cin)    1x1 conv weights
    b_ref: (Cout, 1)      conv bias
    o_ref: (1, Cout, HW)  output block (lane dim = HW -> lane-dense stores)
    """
    x = x_ref[0]                                            # (Cin, HW)
    y = jnp.dot(w_ref[...], x,
                preferred_element_type=jnp.float32)          # (Cout, HW) on MXU
    y = y + b_ref[...]                                       # broadcast bias
    o_ref[0] = y.astype(o_ref.dtype)


# ---------------------------------------------------------------------------
# Wrapper (pallas_call plumbing)
# ---------------------------------------------------------------------------

def outconv_forward(x_nchw, w_oi, b):
    """OutConv.forward: NCHW in, NCHW out.

    x_nchw: (N, Cin, H, W)
    w_oi:   (Cout, Cin)   -- squeezed (Cout, Cin, 1, 1) conv weight
    b:      (Cout,)
    """
    N, Cin, H, W = x_nchw.shape
    Cout = w_oi.shape[0]
    HW = H * W

    x_flat = x_nchw.reshape(N, Cin, HW)       # contiguous reshape, no copy
    b2d = b.reshape(Cout, 1)

    out = pl.pallas_call(
        outconv_kernel,
        out_shape=jax.ShapeDtypeStruct((N, Cout, HW), x_nchw.dtype),
        grid=(N,),
        in_specs=[
            pl.BlockSpec((1, Cin, HW), lambda n: (n, 0, 0)),
            pl.BlockSpec((Cout, Cin), lambda n: (0, 0)),
            pl.BlockSpec((Cout, 1), lambda n: (0, 0)),
        ],
        out_specs=pl.BlockSpec((1, Cout, HW), lambda n: (n, 0, 0)),
        compiler_params=pltpu.CompilerParams(
            dimension_semantics=("parallel",)),
    )(x_flat, w_oi, b2d)

    return out.reshape(N, Cout, H, W)


# ---------------------------------------------------------------------------
# Parameter setup (deterministic, synthetic)
# ---------------------------------------------------------------------------

def init_outconv_params(key, in_channels, out_channels):
    k_w, k_b = jax.random.split(key)
    w = jax.random.normal(k_w, (out_channels, in_channels),
                          jnp.float32) / jnp.sqrt(float(in_channels))
    b = 0.1 * jax.random.normal(k_b, (out_channels,), jnp.float32)
    return w, b


# ---------------------------------------------------------------------------
# Main
# ---------------------------------------------------------------------------

if __name__ == "__main__":
    N, C_IN, C_OUT, H, W = 2, 4, 8, 16, 16

    key = jax.random.PRNGKey(0)
    k_x, k_p = jax.random.split(key)
    x = jax.random.normal(k_x, (N, C_IN, H, W), jnp.float32)   # NCHW like PyTorch
    w, b = init_outconv_params(k_p, C_IN, C_OUT)

    out = outconv_forward(x, w, b)
    out = jax.block_until_ready(out)

    assert out.shape == (N, C_OUT, H, W), out.shape

    # Reference: plain 1x1 conv in jnp.
    ref = jnp.einsum("oc,nchw->nohw", w, x) + b.reshape(1, C_OUT, 1, 1)
    assert jnp.allclose(out, ref, atol=1e-5, rtol=1e-5), float(
        jnp.max(jnp.abs(out - ref)))

    print("KERNEL_OK")
</pallas_src>

<mosaic_0001>
module attributes {stable_mosaic.version = 11 : i64} {
  func.func @outconv_kernel(%arg0: i32, %arg1: memref<1x4x256xf32, #tpu.memory_space<vmem>>, %arg2: memref<8x4xf32, #tpu.memory_space<vmem>>, %arg3: memref<8x1xf32, #tpu.memory_space<vmem>>, %arg4: memref<1x8x256xf32, #tpu.memory_space<vmem>>) attributes {dimension_semantics = [#tpu.dimension_semantics<parallel>], iteration_bounds = array<i64: 2>, scalar_prefetch = 0 : i64, scratch_operands = 0 : i64, tpu.core_type = #tpu.core_type<tc>, window_params = [{transform_indices = @transform_0, window_bounds = array<i64: 1, 4, 256>}, {pipeline_mode = #tpu.pipeline_mode<synchronous>, transform_indices = @transform_1, window_bounds = array<i64: 8, 4>}, {pipeline_mode = #tpu.pipeline_mode<synchronous>, transform_indices = @transform_2, window_bounds = array<i64: 8, 1>}, {transform_indices = @transform_3, window_bounds = array<i64: 1, 8, 256>}]} {
    %c0 = arith.constant 0 : index
    %c0_0 = arith.constant 0 : index
    %c0_1 = arith.constant 0 : index
    %0 = vector.load %arg1[%c0, %c0_0, %c0_1] : memref<1x4x256xf32, #tpu.memory_space<vmem>>, vector<1x4x256xf32>
    %1 = vector.shape_cast %0 : vector<1x4x256xf32> to vector<4x256xf32>
    %c0_2 = arith.constant 0 : index
    %c0_3 = arith.constant 0 : index
    %2 = vector.load %arg2[%c0_2, %c0_3] : memref<8x4xf32, #tpu.memory_space<vmem>>, vector<8x4xf32>
    %cst = arith.constant dense<0.000000e+00> : vector<8x256xf32>
    %3 = tpu.matmul %2, %1, %cst {dimension_numbers = #tpu.dot_dimension_numbers<[1], [0], [0], [1], [0, 0, 1, 1], [], []>} : vector<8x4xf32>, vector<4x256xf32>, vector<8x256xf32> -> vector<8x256xf32>
    %c0_4 = arith.constant 0 : index
    %c0_5 = arith.constant 0 : index
    %4 = vector.load %arg3[%c0_4, %c0_5] : memref<8x1xf32, #tpu.memory_space<vmem>>, vector<8x1xf32>
    %5 = vector.broadcast %4 : vector<8x1xf32> to vector<8x256xf32>
    %6 = arith.addf %3, %5 : vector<8x256xf32>
    %c0_6 = arith.constant 0 : index
    %c0_7 = arith.constant 0 : index
    %c0_8 = arith.constant 0 : index
    %7 = vector.load %arg4[%c0_6, %c0_7, %c0_8] : memref<1x8x256xf32, #tpu.memory_space<vmem>>, vector<1x8x256xf32>
    %8 = vector.shape_cast %7 : vector<1x8x256xf32> to vector<8x256xf32>
    %9 = vector.shape_cast %6 : vector<8x256xf32> to vector<1x8x256xf32>
    tpu.vector_store %arg4[%c0_6, %c0_7, %c0_8], %9 {strides = array<i32>} : memref<1x8x256xf32, #tpu.memory_space<vmem>>, vector<1x8x256xf32>,
    return
  }
  func.func @transform_0(%arg0: i32) -> (i32, i32, i32) {
    %c0_i32 = arith.constant 0 : i32
    %c0_i32_0 = arith.constant 0 : i32
    %c0_i32_1 = arith.constant 0 : i32
    return %arg0, %c0_i32, %c0_i32_0 : i32, i32, i32
  }
  func.func @transform_1(%arg0: i32) -> (i32, i32) {
    %c0_i32 = arith.constant 0 : i32
    %c0_i32_0 = arith.constant 0 : i32
    %c0_i32_1 = arith.constant 0 : i32
    return %c0_i32, %c0_i32_0 : i32, i32
  }
  func.func @transform_2(%arg0: i32) -> (i32, i32) {
    %c0_i32 = arith.constant 0 : i32
    %c0_i32_0 = arith.constant 0 : i32
    %c0_i32_1 = arith.constant 0 : i32
    return %c0_i32, %c0_i32_0 : i32, i32
  }
  func.func @transform_3(%arg0: i32) -> (i32, i32, i32) {
    %c0_i32 = arith.constant 0 : i32
    %c0_i32_0 = arith.constant 0 : i32
    %c0_i32_1 = arith.constant 0 : i32
    return %arg0, %c0_i32, %c0_i32_0 : i32, i32, i32
  }
}

</mosaic_0001>

<bundles_post_ra>
// kernel: tpu_custom_call.1
= control target key start
LH: loop header
LB: loop body
LE: loop exit
PB: predicated region body
PF: predicated region fallthrough
CT: control target
= control target key end

     0   :  { %8 = vsyncpa [#allocation3], 0  ;;  %s588_s0 = inlined_call_operand.vmem [shape: f32[2,4,256], index: 0, kind: input, shape index: {}]   ;;  %s589_s1 = inlined_call_operand.vmem [shape: f32[8,4], index: 1, kind: input, shape index: {}]   ;;  %s590_s2 = inlined_call_operand.vmem [shape: f32[8,1], index: 2, kind: input, shape index: {}]   ;;  %s591_s3 = inlined_call_operand.hbm [shape: f32[2,8,256], index: 3, kind: output, shape index: {}]  }
   0x1   :  { %10 = vsyncpa [#allocation3 + $0x1], 0  ;;  %s482_s12 = smov 0   ;;  %s484_s13 = smov 0  }
   0x2   :  { %s486_s14 = smov 0   ;;  %s488_s15 = smov 0  }
   0x3 LB: > { %s503_s16 = sadd.s32 4294967295, %s457_s15   ;;  %s335_s17 = sadd.s32 4294967294, %s457_s15   ;;  %s457_s15 = sphi %s488_s15, %s597_s15   ;;  %s453_s14 = sphi %s486_s14, %s596_s14   ;;  %s449_s13 = sphi %s484_s13, %s595_s13   ;;  %s445_s12 = sphi %s482_s12, %s594_s12  }
   0x4   : > { %s507_s18 = sadd.s32 1, %s457_s15   ;;  %s91_s19 = sadd.s32 1, %s453_s14 }
   0x5   : > { %s88_s20 = ssub.s32 %s457_s15, %s507_s18  ;;  %p101_p0 = scmp.ne.s32.totalorder %s453_s14, %s449_s13 }
   0x6   : > { %p89_p1 = scmp.eq.s32.totalorder %s88_s20, 0  ;;  %p102_p2 = scmp.eq.s32.totalorder %s503_s16, 1 }
   0x7   : > { %p107_p3 = scmp.ne.s32.totalorder %s449_s13, %s445_s12  ;;  %p108_p4 = scmp.eq.s32.totalorder %s335_s17, 1 }
   0x8   : > { %s518_s21 = scalar_select %p89_p1, %s453_s14, %s91_s19  }
   0x9   : > { %p520_p5 = por %p102_p2, %p101_p0  ;;  %p524_p6 = por %p108_p4, %p107_p3 }
   0xa   : > { %p338_p7 = scmp.ge.s32.totalorder %s457_s15, 1  ;;  %p140_p8 = scmp.lt.s32.totalorder %s457_s15, 3 }
   0xc   : > { %p141_p9 = pnand %p338_p7, %p140_p8 }
   0xd   : > { %p164_p10 = scmp.lt.s32.totalorder (!%p141_p9), %s503_s16, 1  ;;  %v459_v0 = vmov (!%p141_p9), 0.0   ;;  %v460_v1 = vmov (!%p141_p9), 0   ;;  %v171_v2 = vld [vmem:[%s590_s2] sm:$0xff] (!%p141_p9)  ;;  %vm183_vm0 = vcmask (!%p141_p9), 1043456   ;;  %vm179_vm1 = vcmask (!%p141_p9), 31744  }
   0xe   : > { %144 = sbr.rel (%p141_p9) target bundleno = 259 (0x103), region = 32  ;;  %252 = vmatprep.mubr.f32.mxu0 (!%p141_p9), %v459_v0  ;;  %393 = vset.pattern.permute.xlu0 (!%p141_p9), %v460_v1  ;;  %v170_v5 = vld [vmem:[%s589_s1] sm:$0xff] (!%p141_p9)  ;;  %s161_s6 = sand.u32 (!%p141_p9), 1, %s449_s13  }
   0xf   : > { %174 = vperm.xlu0 (!%p141_p9), %393, %v171_v2   ;;  %s339_s7 = sshll.u32 (!%p141_p9), %s161_s6, 4  ;;  %s351_s8 = sshll.u32 (!%p141_p9), %s503_s16, 8 }
  0x10   : > { %s163_s9 = scalar_lea.vmem (!%p141_p9), [#allocation2], %s339_s7  ;;  %s546_s19 = scalar_lea.hbm (!%p141_p9), %s591_s3, %s351_s8 }
  0x11   : > { %s276_s10 = sshll.u32 (!%p141_p9), %s163_s9, 4  ;;  %s262_s20 = scalar_lea.sflag (!%p141_p9), [#allocation3], %s161_s6  ;;  %s548_s10 = int_to_ptr.vmem [resolvable:$true] %s276_s10 }
  0x12   : > { %s461_s24 = smov (!%p141_p9), [#allocation2]  }
  0x13   : > { %s399_s25 = sshll.u32 (!%p141_p9), %s461_s24, 4  ;;  %s400_s25 = int_to_ptr.vmem [resolvable:$false] %s399_s25 }
  0x14   : > { %p402_p0 = scmp.lt.s32.totalorder (!%p141_p9), %s548_s10, %s400_s25 }
  0x15   : > { %s165_s26 = scalar_select %p164_p10, %s503_s16, 1 }
  0x16   : > { %s395_s16 = scalar_lea.vmem %s548_s10, 256 }
  0x17   : > { %s350_s27 = sshll.u32 %s165_s26, 3  ;;  %p396_p11 = scmp.ne.s32.totalorder %s548_s10, %s395_s16 }
  0x18   : > { %s168_s30 = scalar_lea.vmem %s588_s0, %s350_s27  ;;  %s401_s26 = scalar_lea.vmem %s400_s25, 512 }
  0x19   : > { %v169_v3 = vld [vmem:[%s168_s30] sm:$0xff]  ;;  %p397_p12 = pnand %p396_p11, %p520_p5  ;;  %p403_p1 = scmp.lt.s32.totalorder %s401_s26, %s395_s16 }
  0x1a   : > { %v178_v4 = vcombine.high %v169_v3, %v169_v3 }
  0x1b   : > { %p398_p13 = pneg %p397_p12  ;;  %p404_p2 = por %p403_p1, %p402_p0 }
  0x1c   : > { %342 = vmatprep.subr.msk.mxu0 %vm183_vm0, %v178_v4 }
  0x1d   : > { %343 = vmatpush1.msk.msra.mxu0 %vm183_vm0, %v169_v3  ;;  %p405_p3 = pnand %p404_p2, %p398_p13 }
  0x1e   : > { %344 = vmatmul.mubr.msk.f32.vlgmr.msra.gmra.mrb[0].mxu0 %vm179_vm1, %v170_v5 }
  0x8e   : > { %v175_v6 = vpop.permute.xlu0 %174 }
  0xf1   : > { %v254_v7 = vpop.f32.mrb[0].mxu0 }
  0xf2   : > { %v255_v8 = vadd.f32 %v254_v7, %v175_v6  ;;  %v256_v9 = vpop.f32.mrb[1].mxu0 }
  0xf3   : > { %v257_v10 = vadd.f32 %v256_v9, %v175_v6 }
  0xf4   : > { %259 = vst [vmem:[%s163_s9] sm:$0xff] %v255_v8 }
  0xf5   : > { %260 = vst [vmem:[%s163_s9 + $0x8] sm:$0xff] %v257_v10 }
  0xf6   : > { %408 = shalt.err (!%p405_p3)
}
  0xf7   : > { %s409_s27 = scalar_lea.hbm %s546_s19, 256  ;;  %s413_s30 = scalar_lea.hbm %s591_s3, 512 }
  0xf8   : > { %p410_p4 = scmp.ne.s32.totalorder %s546_s19, %s409_s27  ;;  %p414_p9 = scmp.lt.u32.totalorder %s546_s19, %s591_s3 }
  0xf9   : > { %p415_p10 = scmp.lt.u32.totalorder %s413_s30, %s409_s27  ;;  %p417_p12 = scmp.lt.u32.totalorder %s409_s27, %s546_s19 }
  0xfa   : > { %p411_p7 = pnand %p410_p4, %p520_p5 }
  0xfb   : > { %p416_p11 = por %p415_p10, %p414_p9 }
  0xfc   : > { %p412_p8 = pneg %p411_p7 }
  0xfd   : > { %p418_p13 = por %p417_p12, %p416_p11 }
  0xff   : > { %p419_p0 = pnand %p418_p13, %p412_p8 }
 0x101   : > { %422 = shalt.err (!%p419_p0)
}
 0x102   : > { %352 = dma.vmem_to_hbm [thread:$0]  (%p520_p5), %s548_s10, 256, %s546_s19, %s262_s20  }
 0x103 PF: > { %p358_p1 = scmp.ge.s32.totalorder %s457_s15, 2  ;;  %s288_s6 = sand.u32 1, %s445_s12  }
 0x104   : > { %s289_s7 = scalar_lea.sflag [#allocation3], %s288_s6 }
 0x105   : > { %p355_p2 = pnand %p358_p1, %p524_p6 }
 0x107   : > { %440 = dma.done.wait (!%p355_p2), %s289_s7, 256  }
 0x108   : > { %442 = vsyncadd (!%p355_p2), %s289_s7, 4294967040  ;;  %p13_p3 = scmp.ge.s32.totalorder %s507_s18, 4   ;;  %s594_s12 = smov %s449_s13 }
 0x109   : > { %s595_s13 = smov %s453_s14  ;;  %s596_s14 = smov %s518_s21 }
 0x10a   : > { %s597_s15 = smov %s507_s18  ;;  %15 = sbr.rel (!%p13_p3) target bundleno = 3 (0x3), region = 67 }
 0x111   :  { %294 = vsyncpa [#allocation3], 1 }
 0x112   :  { %296 = vsyncpa [#allocation3 + $0x1], 1 }

</bundles_post_ra>
